<compile_context>
chip_gen: v5e
topology: v5e:2x2
jax: 0.10.0
libtpu: 0.0.40
codegen_flags: <defaults>
</compile_context>

<pallas_src>
import jax
import jax.numpy as jnp
from jax.experimental import pallas as pl
from jax.experimental.pallas import tpu as pltpu


def _round_up(v, m):
    return (v + m - 1) // m * m


def _pick_row_tile(n_patches, max_tile):
    """Largest row tile that is a multiple of 8, divides n_patches, <= max_tile."""
    for t in (512, 256, 128, 64, 32, 16, 8):
        if t <= max_tile and n_patches % t == 0:
            return t
    # TODO(synk): n_patches not a multiple of 8 -> fall back to full patch rows.
    return n_patches


def _embeddings_kernel(xp_ref, w_ref, pos_ref, o_ref):
    # xp_ref : (TM, Kp)   row tile of flattened patches (K zero-padded to Kp)
    # w_ref  : (Kp, Cp)   conv weight as a projection matrix (zero-padded)
    # pos_ref: (TM, Cp)   position embeddings + conv bias (zero-padded, f32)
    # o_ref  : (TM, Cp)
    acc = jnp.dot(xp_ref[...], w_ref[...], preferred_element_type=jnp.float32)
    # TODO(synk): Dropout(0.1) is identity in eval mode; training-mode dropout
    # (pltpu.prng_* + mask) is intentionally not applied here.
    o_ref[...] = (acc + pos_ref[...]).astype(o_ref.dtype)


def embeddings_forward(x, weight, bias, pos_emb, patch_size, *, max_row_tile=256):
    """x: (B, C, H, W) NCHW. weight: (C_out, C_in, ph, pw). Returns (B, N, C_out)."""
    B, C, H, W = x.shape
    ph, pw = patch_size
    assert H % ph == 0 and W % pw == 0, "patch size must divide the image"
    gh, gw = H // ph, W // pw
    N = gh * gw
    C_out = weight.shape[0]
    K = C * ph * pw

    # Lane-dense padded dims (last-dim multiples of 128) and row tile.
    Kp = _round_up(K, 128)
    Cp = _round_up(C_out, 128)
    TM = _pick_row_tile(N, max_row_tile)
    rows = B * N
    rep = max(N // TM, 1)  # position-embedding period, in row tiles

    # Patchify: (B, C, H, W) -> (B*N, K) with (c, ph, pw) feature ordering so it
    # matches weight.reshape(C_out, K).  allow_input_fusion below permits XLA to
    # fuse this transpose/pad into the kernel's input fetch (under jit) rather
    # than materializing the patchified tensor in HBM.
    xp = x.reshape(B, C, gh, ph, gw, pw)
    xp = jnp.transpose(xp, (0, 2, 4, 1, 3, 5)).reshape(rows, K)
    xp = jnp.pad(xp, ((0, 0), (0, Kp - K)))

    w_mat = jnp.pad(weight.reshape(C_out, K).T, ((0, Kp - K), (0, Cp - C_out)))
    # Fold the conv bias into the position embedding (one fewer input stream).
    pos_b = (pos_emb.reshape(N, C_out).astype(jnp.float32)
             + bias.reshape(1, C_out).astype(jnp.float32))
    pos_b = jnp.pad(pos_b, ((0, 0), (0, Cp - C_out)))

    itemsize = jnp.dtype(x.dtype).itemsize
    # Double-buffered activations/pos/output + single-buffered weight, with 2x
    # headroom; capped at 64 MiB so the limit is valid on v7x as well.
    block_bytes = (2 * TM * Kp * itemsize      # activations (in)
                   + Kp * Cp * itemsize        # weight (single buffer)
                   + 2 * TM * Cp * 4           # pos + bias (f32)
                   + 2 * TM * Cp * itemsize)   # output
    vmem_limit = int(min(max(2 * block_bytes, 16 * 2**20), 64 * 2**20))

    cost = pl.CostEstimate(
        flops=2 * rows * Kp * Cp,
        transcendentals=0,
        bytes_accessed=int((rows * Kp + Kp * Cp + N * Cp + rows * Cp) * itemsize),
    )

    out_flat = pl.pallas_call(
        _embeddings_kernel,
        out_shape=jax.ShapeDtypeStruct((rows, Cp), x.dtype),
        grid_spec=pltpu.PrefetchScalarGridSpec(
            num_scalar_prefetch=0,
            grid=(rows // TM,),
            in_specs=[
                pl.BlockSpec((TM, Kp), lambda r: (r, 0)),
                # Grid-invariant weight: fetched once, keep a single VMEM buffer.
                pl.BlockSpec((Kp, Cp), lambda r: (0, 0),
                             pipeline_mode=pl.Buffered(1)),
                # Position embeddings repeat every N rows (= rep row tiles).
                pl.BlockSpec((TM, Cp), lambda r: (r % rep, 0)),
            ],
            out_specs=pl.BlockSpec((TM, Cp), lambda r: (r, 0)),
        ),
        compiler_params=pltpu.CompilerParams(
            dimension_semantics=("parallel",),
            vmem_limit_bytes=vmem_limit,
            allow_input_fusion=[True, False, False],
        ),
        cost_estimate=cost,
    )(xp, w_mat, pos_b)

    # Drop lane padding and restore (B, N, C_out).
    return out_flat[:, :C_out].reshape(B, N, C_out)


def reference_forward(x, weight, bias, pos_emb, patch_size):
    """Pure-JAX reference matching the PyTorch module (eval mode)."""
    ph, pw = patch_size
    y = jax.lax.conv_general_dilated(
        x, weight, window_strides=(ph, pw), padding="VALID",
        dimension_numbers=("NCHW", "OIHW", "NCHW"))
    y = y + bias.reshape(1, -1, 1, 1)
    B, C_out, gh, gw = y.shape
    y = y.reshape(B, C_out, gh * gw)      # flatten(2)
    y = jnp.transpose(y, (0, 2, 1))       # transpose(-1, -2)
    return y + pos_emb                    # dropout(eval) = identity


if __name__ == "__main__":
    # Small shapes consistent with the module: img 16x16, patch 4, 4 channels.
    B, C, H, W = 2, 4, 16, 16
    patch = (4, 4)
    n_patches = (H // patch[0]) * (W // patch[1])

    key = jax.random.PRNGKey(0)
    kx, kw, kb, kp = jax.random.split(key, 4)
    x = jax.random.normal(kx, (B, C, H, W), dtype=jnp.float32)
    # Deterministic synthetic parameters (Conv2d: (C_out=C, C_in=C, ph, pw)).
    weight = jax.random.normal(kw, (C, C, patch[0], patch[1]), dtype=jnp.float32) * 0.1
    bias = jax.random.normal(kb, (C,), dtype=jnp.float32) * 0.1
    # nn.Parameter(torch.zeros(1, n_patches, C)) is zero-init; use small randoms
    # so the add path is actually exercised (deterministic either way).
    pos_emb = jax.random.normal(kp, (1, n_patches, C), dtype=jnp.float32) * 0.01

    out = jax.block_until_ready(embeddings_forward(x, weight, bias, pos_emb, patch))
    ref = reference_forward(x, weight, bias, pos_emb, patch)

    assert out.shape == (B, n_patches, C), out.shape
    assert jnp.allclose(out, ref, atol=1e-4, rtol=1e-4), \
        float(jnp.max(jnp.abs(out - ref)))

    print("KERNEL_OK")
</pallas_src>

<mosaic_0001>
module attributes {stable_mosaic.version = 11 : i64} {
  func.func @_embeddings_kernel(%arg0: i32, %arg1: memref<16x128xf32, #tpu.memory_space<vmem>>, %arg2: memref<128x128xf32, #tpu.memory_space<vmem>>, %arg3: memref<16x128xf32, #tpu.memory_space<vmem>>, %arg4: memref<16x128xf32, #tpu.memory_space<vmem>>) attributes {dimension_semantics = [#tpu.dimension_semantics<parallel>], iteration_bounds = array<i64: 2>, scalar_prefetch = 0 : i64, scratch_operands = 0 : i64, tpu.core_type = #tpu.core_type<tc>, window_params = [{transform_indices = @transform_0, window_bounds = array<i64: 16, 128>}, {pipeline_mode = #tpu.pipeline_mode<synchronous>, transform_indices = @transform_1, window_bounds = array<i64: 128, 128>}, {transform_indices = @transform_2, window_bounds = array<i64: 16, 128>}, {transform_indices = @transform_3, window_bounds = array<i64: 16, 128>}]} {
    %c0 = arith.constant 0 : index
    %c0_0 = arith.constant 0 : index
    %0 = vector.load %arg1[%c0, %c0_0] : memref<16x128xf32, #tpu.memory_space<vmem>>, vector<16x128xf32>
    %c0_1 = arith.constant 0 : index
    %c0_2 = arith.constant 0 : index
    %1 = vector.load %arg2[%c0_1, %c0_2] : memref<128x128xf32, #tpu.memory_space<vmem>>, vector<128x128xf32>
    %cst = arith.constant dense<0.000000e+00> : vector<16x128xf32>
    %2 = tpu.matmul %0, %1, %cst {dimension_numbers = #tpu.dot_dimension_numbers<[1], [0], [0], [1], [0, 0, 1, 1], [], []>} : vector<16x128xf32>, vector<128x128xf32>, vector<16x128xf32> -> vector<16x128xf32>
    %c0_3 = arith.constant 0 : index
    %c0_4 = arith.constant 0 : index
    %3 = vector.load %arg3[%c0_3, %c0_4] : memref<16x128xf32, #tpu.memory_space<vmem>>, vector<16x128xf32>
    %4 = arith.addf %2, %3 : vector<16x128xf32>
    %c0_5 = arith.constant 0 : index
    %c0_6 = arith.constant 0 : index
    %5 = vector.load %arg4[%c0_5, %c0_6] : memref<16x128xf32, #tpu.memory_space<vmem>>, vector<16x128xf32>
    tpu.vector_store %arg4[%c0_5, %c0_6], %4 {strides = array<i32>} : memref<16x128xf32, #tpu.memory_space<vmem>>, vector<16x128xf32>,
    return
  }
  func.func @transform_0(%arg0: i32) -> (i32, i32) {
    %c0_i32 = arith.constant 0 : i32
    %c0_i32_0 = arith.constant 0 : i32
    return %arg0, %c0_i32 : i32, i32
  }
  func.func @transform_1(%arg0: i32) -> (i32, i32) {
    %c0_i32 = arith.constant 0 : i32
    %c0_i32_0 = arith.constant 0 : i32
    %c0_i32_1 = arith.constant 0 : i32
    return %c0_i32, %c0_i32_0 : i32, i32
  }
  func.func @transform_2(%arg0: i32) -> (i32, i32) {
    %c1_i32 = arith.constant 1 : i32
    %c0_i32 = arith.constant 0 : i32
    %0 = arith.cmpi eq, %c1_i32, %c0_i32 : i32
    %c1_i32_0 = arith.constant 1 : i32
    %1 = arith.select %0, %c1_i32_0, %c1_i32 : i32
    %2 = arith.remsi %arg0, %1 : i32
    %c0_i32_1 = arith.constant 0 : i32
    %3 = arith.cmpi ne, %2, %c0_i32_1 : i32
    %c0_i32_2 = arith.constant 0 : i32
    %4 = arith.cmpi slt, %2, %c0_i32_2 : i32
    %c0_i32_3 = arith.constant 0 : i32
    %5 = arith.cmpi slt, %1, %c0_i32_3 : i32
    %6 = arith.xori %4, %5 : i1
    %7 = arith.andi %6, %3 : i1
    %8 = arith.addi %2, %1 : i32
    %9 = arith.select %7, %8, %2 : i32
    %c0_i32_4 = arith.constant 0 : i32
    %c0_i32_5 = arith.constant 0 : i32
    return %9, %c0_i32_4 : i32, i32
  }
  func.func @transform_3(%arg0: i32) -> (i32, i32) {
    %c0_i32 = arith.constant 0 : i32
    %c0_i32_0 = arith.constant 0 : i32
    return %arg0, %c0_i32 : i32, i32
  }
}

</mosaic_0001>

<bundles_post_ra>
// kernel: tpu_custom_call.1
= control target key start
LH: loop header
LB: loop body
LE: loop exit
PB: predicated region body
PF: predicated region fallthrough
CT: control target
= control target key end

     0   :  { %8 = vsyncpa [#allocation3], 0  ;;  %s832_s0 = inlined_call_operand.hbm [shape: f32[32,128], index: 0, kind: input, shape index: {}]   ;;  %s833_s1 = inlined_call_operand.hbm [shape: f32[128,128], index: 1, kind: input, shape index: {}]   ;;  %s834_s2 = inlined_call_operand.hbm [shape: f32[16,128], index: 2, kind: input, shape index: {}]   ;;  %s835_s3 = inlined_call_operand.hbm [shape: f32[32,128], index: 3, kind: output, shape index: {}]  }
   0x1   :  { %10 = vsyncpa [#allocation3 + $0x1], 0 }
   0x2   :  { %11 = vsyncpa [#allocation6], 0 }
   0x3   :  { %12 = vsyncpa [#allocation4], 0 }
   0x4   :  { %14 = vsyncpa [#allocation4 + $0x1], 0  ;;  %s674_s12 = smov 0   ;;  %s676_s13 = smov 0  }
   0x5   :  { %s678_s14 = smov 0   ;;  %s680_s15 = smov 0  }
   0x6 LB: > { %s695_s16 = sadd.s32 4294967295, %s646_s15   ;;  %s379_s17 = sadd.s32 4294967294, %s646_s15   ;;  %s646_s15 = sphi %s680_s15, %s845_s15   ;;  %s642_s14 = sphi %s678_s14, %s844_s14   ;;  %s638_s13 = sphi %s676_s13, %s843_s13   ;;  %s634_s12 = sphi %s674_s12, %s842_s12  }
   0x7   : > { %p40_p0 = scmp.ne.s32.totalorder %s638_s13, %s634_s12  ;;  %p41_p1 = scmp.eq.s32.totalorder %s695_s16, 0 }
   0x8   : > { %p106_p2 = scmp.eq.s32.totalorder %s695_s16, 1  ;;  %p112_p3 = scmp.eq.s32.totalorder %s379_s17, 1 }
   0x9   : > { %p704_p4 = por %p41_p1, %p40_p0  ;;  %p380_p5 = scmp.ge.s32.totalorder %s646_s15, 1 }
   0xa   : > { %p709_p6 = por %p112_p3, %p40_p0  ;;  %p119_p7 = scmp.lt.s32.totalorder %s646_s15, 3 }
   0xb   : > { %s130_s22 = sshll.u32 %s833_s1, 4  ;;  %s648_s24 = smov [#allocation5]   ;;  %s131_s22 = int_to_ptr.hbm [resolvable:$true] %s130_s22 }
   0xc   : > { %p717_p8 = pnand %p380_p5, %p119_p7  ;;  %s132_s25 = sshll.u32 %s648_s24, 4  ;;  %s133_s25 = int_to_ptr.vmem [resolvable:$true] %s132_s25 }
   0xd   : > { %s144_s28 = sshll.u32 %s834_s2, 4  ;;  %s649_s29 = smov 128   ;;  %s145_s28 = int_to_ptr.hbm [resolvable:$true] %s144_s28 }
   0xe   : > { %p427_p9 = pneg %p717_p8  ;;  %s650_s30 = smov 8  }
   0xf   : > { %s651_s4 = smov [#allocation7]   ;;  %s736_s6 = sadd.s32 1, %s646_s15  }
  0x10   : > { %p428_p10 = pnand %p427_p9, %p41_p1  ;;  %s146_s5 = sshll.u32 %s651_s4, 4  ;;  %s147_s5 = int_to_ptr.vmem [resolvable:$true] %s146_s5 }
  0x11   : > { %s27_s7 = sadd.s32 1, %s642_s14  ;;  %s24_s8 = ssub.s32 %s646_s15, %s736_s6 }
  0x12   : > { %430 = dma.hbm_to_vmem [thread:$0]  (!%p428_p10), %s131_s22, 2048, %s133_s25, [#allocation6], %s649_s29, %s649_s29, %s650_s30  }
  0x13   : > { %433 = dma.hbm_to_vmem [thread:$0]  (!%p428_p10), %s145_s28, 256, %s147_s5, [#allocation6], %s649_s29, %s649_s29, %s650_s30  }
  0x14   : > { %p34_p12 = scmp.ne.s32.totalorder %s642_s14, %s638_s13  ;;  %p25_p13 = scmp.eq.s32.totalorder %s24_s8, 0 }
  0x15   : > { %p35_p0 = scmp.eq.s32.totalorder %s646_s15, 0  ;;  %p444_p5 = scmp.lt.s32.totalorder %s646_s15, 2 }
  0x16   : > { %p746_p3 = por %p106_p2, %p34_p12  ;;  %s160_s11 = sand.u32 1, %s642_s14  }
  0x17   : > { %s752_s10 = scalar_select %p25_p13, %s642_s14, %s27_s7  }
  0x18   : > { %p36_p7 = por %p35_p0, %p34_p12  ;;  %s384_s17 = sshll.u32 %s160_s11, 4 }
  0x19   : > { %s397_s20 = sshll.u32 %s646_s15, 4  ;;  %s164_s25 = scalar_lea.vmem [#allocation2], %s384_s17 }
  0x1a   : > { %s169_s24 = scalar_lea.hbm %s832_s0, %s397_s20  ;;  %s172_s26 = sshll.u32 %s164_s25, 4  ;;  %s173_s26 = int_to_ptr.vmem [resolvable:$true] %s172_s26 }
  0x1b   : > { %s170_s27 = sshll.u32 %s169_s24, 4  ;;  %p759_p2 = pnand %p444_p5, %p36_p7  ;;  %s171_s27 = int_to_ptr.hbm [resolvable:$true] %s170_s27 }
  0x1c   : > { %s161_s4 = scalar_lea.sflag [#allocation3], %s160_s11  ;;  %s546_s5 = sshra.s32 %s171_s27, 4  ;;  %s547_s5 = int_to_ptr.hbm [resolvable:$true] %s546_s5 }
  0x1d   : > { %s548_s7 = scalar_lea.hbm %s547_s5, 16  ;;  %p550_p10 = pneg %p759_p2 }
  0x1e   : > { %p549_p9 = scmp.ne.s32.totalorder %s547_s5, %s548_s7  ;;  %s553_s20 = scalar_lea.hbm %s832_s0, 32 }
  0x1f   : > { %p554_p0 = scmp.lt.s32.totalorder %s547_s5, %s832_s0  ;;  %p555_p5 = scmp.lt.s32.totalorder %s553_s20, %s548_s7 }
  0x20   : > { %p551_p12 = pnand %p550_p10, %p549_p9 }
  0x21   : > { %p556_p7 = por %p555_p5, %p554_p0 }
  0x22   : > { %p552_p13 = pneg %p551_p12 }
  0x24   : > { %p557_p11 = pnand %p556_p7, %p552_p13 }
  0x26   : > { %560 = shalt.err (!%p557_p11)
}
  0x27   : > { %437 = dma.hbm_to_vmem [thread:$0]  (!%p759_p2), %s171_s27, 256, %s173_s26, %s161_s4, %s649_s29, %s649_s29, %s650_s30  }
  0x28   : > { %184 = sbr.rel (%p717_p8) target bundleno = 213 (0xd5), region = 32  ;;  %s779_s11 = sand.u32 (!%p717_p8), 1, %s638_s13  }
  0x29   : > { %s388_s24 = sshll.u32 (!%p717_p8), %s779_s11, 4  ;;  %s187_s25 = scalar_lea.sflag (!%p717_p8), [#allocation3], %s779_s11 }
  0x2a   : > { %s785_s5 = scalar_lea.vmem (!%p717_p8), [#allocation2], %s388_s24 }
  0x2d   : > { %621 = dma.done.wait (%p704_p4), %s187_s25, 256  }
  0x2e   : > { %623 = vsyncadd (%p704_p4), %s187_s25, 4294967040 }
  0x2f   : > { %625 = dma.done.wait (%p41_p1), [#allocation6], 2304  }
  0x30   : > { %627 = vsyncadd (%p41_p1), [#allocation6], 4294964992  ;;  %v243_v0 = vld [vmem:[#allocation5 + $0x78] sm:$0xff]  ;;  %v242_v1 = vld [vmem:[#allocation5 + $0x70] sm:$0xff]  ;;  %s398_s18 = sshll.u32 %s695_s16, 4  ;;  %s223_s26 = scalar_lea.vmem [#allocation8], %s388_s24 }
  0x31   : > { %246 = vmatpush.msra.mxu0 %v243_v0  ;;  %399 = vmatpush.msra.mxu1 %v243_v0  ;;  %v241_v2 = vld [vmem:[#allocation5 + $0x68] sm:$0xff]  ;;  %v240_v3 = vld [vmem:[#allocation5 + $0x60] sm:$0xff]  ;;  %v239_v4 = vld [vmem:[#allocation5 + $0x58] sm:$0xff]  ;;  %s283_s30 = scalar_lea.hbm %s835_s3, %s398_s18  ;;  %s284_s27 = sshll.u32 %s223_s26, 4  ;;  %s285_s27 = int_to_ptr.vmem [resolvable:$true] %s284_s27 }
  0x32   : > { %v238_v5 = vld [vmem:[#allocation5 + $0x50] sm:$0xff]  ;;  %v237_v6 = vld [vmem:[#allocation5 + $0x48] sm:$0xff]  ;;  %v236_v7 = vld [vmem:[#allocation5 + $0x40] sm:$0xff]  ;;  %s286_s28 = sshll.u32 %s283_s30, 4  ;;  %s272_s16 = scalar_lea.sflag [#allocation4], %s779_s11  ;;  %s287_s28 = int_to_ptr.hbm [resolvable:$true] %s286_s28 }
  0x33   : > { %247 = vmatpush.msra.mxu0 %v242_v1  ;;  %400 = vmatpush.msra.mxu1 %v242_v1  ;;  %v235_v8 = vld [vmem:[#allocation5 + $0x38] sm:$0xff]  ;;  %v234_v9 = vld [vmem:[#allocation5 + $0x30] sm:$0xff]  ;;  %v233_v10 = vld [vmem:[#allocation5 + $0x28] sm:$0xff]  ;;  %s590_s4 = sshra.s32 %s287_s28, 4  ;;  %s596_s20 = scalar_lea.hbm %s835_s3, 32  ;;  %s591_s4 = int_to_ptr.hbm [resolvable:$true] %s590_s4 }
  0x34   : > { %v232_v11 = vld [vmem:[#allocation5 + $0x20] sm:$0xff]  ;;  %v231_v12 = vld [vmem:[#allocation5 + $0x18] sm:$0xff]  ;;  %v230_v13 = vld [vmem:[#allocation5 + $0x10] sm:$0xff]  ;;  %s592_s7 = scalar_lea.hbm %s591_s4, 16  ;;  %p597_p11 = scmp.lt.s32.totalorder %s591_s4, %s835_s3 }
  0x35   : > { %248 = vmatpush.msra.mxu0 %v241_v2  ;;  %401 = vmatpush.msra.mxu1 %v241_v2  ;;  %v229_v14 = vld [vmem:[#allocation5 + $0x8] sm:$0xff]  ;;  %v228_v15 = vld [vmem:[#allocation5] sm:$0xff]  ;;  %p593_p1 = scmp.ne.s32.totalorder %s591_s4, %s592_s7  ;;  %p598_p2 = scmp.lt.s32.totalorder %s596_s20, %s592_s7 }
  0x36   : > { %v226_v16 = vld [vmem:[%s785_s5] sm:$0xff]  ;;  %v227_v17 = vld [vmem:[%s785_s5 + $0x8] sm:$0xff] }
  0x37   : > { %249 = vmatpush.msra.mxu0 %v240_v3  ;;  %402 = vmatpush.msra.mxu1 %v240_v3  ;;  %v244_v18 = vld [vmem:[#allocation7] sm:$0xff]  ;;  %v245_v19 = vld [vmem:[#allocation7 + $0x8] sm:$0xff]  ;;  %p594_p4 = pnand %p593_p1, %p746_p3  ;;  %p599_p9 = por %p598_p2, %p597_p11 }
  0x39   : > { %250 = vmatpush.msra.mxu0 %v239_v4  ;;  %403 = vmatpush.msra.mxu1 %v239_v4  ;;  %p595_p8 = pneg %p594_p4 }
  0x3b   : > { %251 = vmatpush.msra.mxu0 %v238_v5  ;;  %404 = vmatpush.msra.mxu1 %v238_v5  ;;  %p600_p10 = pnand %p599_p9, %p595_p8 }
  0x3d   : > { %252 = vmatpush.msra.mxu0 %v237_v6  ;;  %405 = vmatpush.msra.mxu1 %v237_v6 }
  0x3f   : > { %253 = vmatpush.msra.mxu0 %v236_v7  ;;  %406 = vmatpush.msra.mxu1 %v236_v7 }
  0x41   : > { %254 = vmatpush.msra.mxu0 %v235_v8  ;;  %407 = vmatpush.msra.mxu1 %v235_v8 }
  0x43   : > { %255 = vmatpush.msra.mxu0 %v234_v9  ;;  %408 = vmatpush.msra.mxu1 %v234_v9 }
  0x45   : > { %256 = vmatpush.msra.mxu0 %v233_v10  ;;  %409 = vmatpush.msra.mxu1 %v233_v10 }
  0x47   : > { %257 = vmatpush.msra.mxu0 %v232_v11  ;;  %410 = vmatpush.msra.mxu1 %v232_v11 }
  0x49   : > { %258 = vmatpush.msra.mxu0 %v231_v12  ;;  %411 = vmatpush.msra.mxu1 %v231_v12 }
  0x4b   : > { %259 = vmatpush.msra.mxu0 %v230_v13  ;;  %412 = vmatpush.msra.mxu1 %v230_v13 }
  0x4d   : > { %260 = vmatpush.msra.mxu0 %v229_v14  ;;  %413 = vmatpush.msra.mxu1 %v229_v14 }
  0x4f   : > { %261 = vmatpush.msra.mxu0 %v228_v15  ;;  %414 = vmatpush.msra.mxu1 %v228_v15 }
  0x50   : > { %262 = vmatmul.f32.vlgmr.msra.gmra.mxu0 %v226_v16  ;;  %265 = vmatmul.f32.vlgmr.msra.gmra.mxu1 %v227_v17 }
  0xcd   : > { %v263_v20 = vpop.f32.mrf.mxu0  ;;  %v266_v21 = vpop.f32.mrf.mxu1 }
  0xce   : > { %v264_v22 = vadd.f32 %v263_v20, %v244_v18  ;;  %v267_v23 = vadd.f32 %v266_v21, %v245_v19 }
  0xd0   : > { %269 = vst [vmem:[%s223_s26] sm:$0xff] %v264_v22 }
  0xd1   : > { %270 = vst [vmem:[%s223_s26 + $0x8] sm:$0xff] %v267_v23 }
  0xd2   : > { %603 = shalt.err (!%p600_p10)
}
  0xd3   : > { %s652_s11 = smov 128   ;;  %s653_s24 = smov 8  }
  0xd4   : > { %425 = dma.vmem_to_hbm [thread:$0]  (%p746_p3), %s285_s27, 256, %s287_s28, %s272_s16, %s652_s11, %s652_s11, %s653_s24  }
  0xd5 PF: > { %s301_s25 = sand.u32 1, %s634_s12   ;;  %p841_p12 = scmp.ge.s32.totalorder %s646_s15, 2 }
  0xd6   : > { %s302_s5 = scalar_lea.sflag [#allocation4], %s301_s25 }
  0xd7   : > { %p439_p13 = pnand %p841_p12, %p709_p6 }
  0xd9   : > { %p440_p0 = pneg %p439_p13 }
  0xdb   : > { %629 = dma.done.wait (%p440_p0), %s302_s5, 256  }
  0xdc   : > { %631 = vsyncadd (%p440_p0), %s302_s5, 4294967040  ;;  %p17_p5 = scmp.ge.s32.totalorder %s736_s6, 4   ;;  %s842_s12 = smov %s638_s13 }
  0xdd   : > { %s843_s13 = smov %s642_s14  ;;  %s844_s14 = smov %s752_s10 }
  0xde   : > { %s845_s15 = smov %s736_s6  ;;  %19 = sbr.rel (!%p17_p5) target bundleno = 6 (0x6), region = 85 }
  0xe3   :  { %308 = vsyncpa [#allocation3], 1 }
  0xe4   :  { %310 = vsyncpa [#allocation3 + $0x1], 1 }
  0xe5   :  { %311 = vsyncpa [#allocation6], 1 }
  0xe6   :  { %312 = vsyncpa [#allocation4], 1 }
  0xe7   :  { %314 = vsyncpa [#allocation4 + $0x1], 1 }

</bundles_post_ra>
